<compile_context>
chip_gen: v6e
topology: v6e:2x2x1
jax: 0.10.0
libtpu: 0.0.40
codegen_flags: <defaults>
</compile_context>

<pallas_src>
import functools

import jax
import jax.numpy as jnp
from jax import lax
from jax.experimental import pallas as pl
from jax.experimental.pallas import tpu as pltpu


def _round_up(x, m):
    return (x + m - 1) // m * m


def _tpu_info():
    """Best-effort TPU generation / VMEM capacity query with safe fallbacks."""
    kind = ""
    try:
        kind = jax.devices()[0].device_kind.lower()
    except Exception:  # pragma: no cover - defensive
        pass
    is_v7 = "v7" in kind
    newgen = ("v6" in kind) or is_v7           # 256x256 MXU, bf16 VALU
    vmem_cap = None
    try:
        vmem_cap = int(pltpu.get_tpu_info().vmem_capacity_bytes)
    except Exception:
        vmem_cap = None
    if not vmem_cap or vmem_cap <= 0:
        vmem_cap = (64 if is_v7 else 128) * 1024 * 1024
    return kind, newgen, is_v7, vmem_cap


def _pool_contrib(text_ref, emb_vals, v_base, col0, sub_b, n_s8, counts_dtype):
    """Sum of embeddings over the sequence for one batch sub-tile.

    text_ref : (S_pad, tile_b) int32 ref (padding rows/cols hold -1)
    emb_vals : (tile_v, E_pad)  bf16  value (one vocab tile)
    Returns  : (sub_b, E_pad)   f32   sum_s emb[text[s, col0:col0+sub_b]]
               restricted to vocab ids in [v_base, v_base + tile_v).
    """
    tile_v = emb_vals.shape[0]
    vocab_ids = v_base + lax.broadcasted_iota(jnp.int32, (tile_v, sub_b), 0)

    def body(i, counts_t):
        s0 = pl.multiple_of(i * 8, 8)
        # One full-vreg int32 slab per vld; 8 compares unrolled inside.
        slab = text_ref[pl.ds(s0, 8), pl.ds(col0, sub_b)]        # (8, sub_b)
        for k in range(8):
            counts_t = counts_t + (slab[k:k + 1, :] == vocab_ids).astype(
                counts_dtype)
        return counts_t

    counts_t = lax.fori_loop(
        0, n_s8, body, jnp.zeros((tile_v, sub_b), counts_dtype),
        unroll=bool(n_s8 <= 4))

    # Gather + sum-pool as one MXU matmul: contract the vocab-tile axis of
    # both operands (no transpose copy), accumulate in f32.
    return lax.dot_general(
        counts_t.astype(emb_vals.dtype), emb_vals,
        dimension_numbers=(((0,), (0,)), ((), ())),
        preferred_element_type=jnp.float32)                      # (sub_b, E_pad)


def _fasttext_resident_kernel(text_ref, emb_ref, w_ref, b_ref, out_ref, *,
                              n_s8, n_sub, sub_b, counts_dtype):
    """Small-vocab path: whole embedding table resident, one step per batch tile."""
    emb_vals = emb_ref[...]
    w = w_ref[...]
    bias = b_ref[...]
    for sub in range(n_sub):
        col0 = sub * sub_b
        pooled = _pool_contrib(text_ref, emb_vals, 0, col0, sub_b, n_s8,
                               counts_dtype)                     # (sub_b, E_pad) f32
        out = jnp.dot(pooled.astype(w.dtype), w,
                      preferred_element_type=jnp.float32) + bias
        out_ref[pl.ds(col0, sub_b), :] = out.astype(out_ref.dtype)


def _fasttext_streaming_kernel(text_ref, emb_ref, w_ref, b_ref, out_ref,
                               pooled_acc, *, n_s8, n_sub, sub_b, counts_dtype):
    """Large-vocab path: vocab tiles stream over the trailing reduction axis."""
    v_idx = pl.program_id(1)
    n_v = pl.num_programs(1)
    tile_v = emb_ref.shape[0]
    v_base = v_idx * tile_v
    emb_vals = emb_ref[...]

    @pl.when(v_idx == 0)
    def _():
        pooled_acc[...] = jnp.zeros_like(pooled_acc)

    for sub in range(n_sub):
        col0 = sub * sub_b
        contrib = _pool_contrib(text_ref, emb_vals, v_base, col0, sub_b, n_s8,
                                counts_dtype)
        pooled_acc[pl.ds(col0, sub_b), :] = (
            pooled_acc[pl.ds(col0, sub_b), :] + contrib)

    @pl.when(v_idx == n_v - 1)
    def _():
        w = w_ref[...]
        out = jnp.dot(pooled_acc[...].astype(w.dtype), w,
                      preferred_element_type=jnp.float32) + b_ref[...]
        out_ref[...] = out.astype(out_ref.dtype)


def fasttext_forward(text, emb_table, fc_weight, fc_bias, *,
                     emb_dtype=jnp.bfloat16, force_streaming=False):
    """text: (S, B) int; emb_table: (V, E); fc_weight: (O, E); fc_bias: (O,)."""
    S, B = text.shape
    V, E = emb_table.shape
    O = fc_weight.shape[0]
    emb_bytes = jnp.dtype(emb_dtype).itemsize

    _, newgen, is_v7, vmem_cap = _tpu_info()
    budget = (vmem_cap * 3) // 4           # leave headroom under physical VMEM

    # Lane/sublane-friendly padded shapes.
    S_pad = _round_up(S, 8)
    E_pad = _round_up(E, 128)
    O_pad = _round_up(O, 128)
    n_s8 = S_pad // 8

    # Batch tiling: large tile for embedding-table reuse, <=128-wide sub-tiles
    # inside the kernel keep the live counts tile small.
    sub_b = min(128, _round_up(B, 8))
    tile_b = min(256 if is_v7 else 512, _round_up(B, sub_b))
    tile_b = _round_up(tile_b, sub_b)
    B_pad = _round_up(B, tile_b)
    n_b = B_pad // tile_b
    if is_v7 and n_b == 1 and tile_b > sub_b:
        # Give both v7x TensorCores a batch tile.
        tile_b = sub_b * max(1, (tile_b // sub_b) // 2)
        B_pad = _round_up(B, tile_b)
        n_b = B_pad // tile_b
    n_sub = tile_b // sub_b

    # counts are exact in bf16 only for seq_len <= 256; bf16 VALU on v6e/v7x.
    counts_dtype = jnp.bfloat16 if (newgen and S <= 256) else jnp.float32

    # Resident-table vs streaming path selection.
    V_small_pad = _round_up(max(V, 1), 128)
    table_bytes = V_small_pad * E_pad * emb_bytes
    resident_foot = (2 * S_pad * tile_b * 4          # text (double-buffered)
                     + 2 * table_bytes               # full emb table
                     + 2 * E_pad * O_pad * 2         # fc weight (bf16)
                     + 2 * O_pad * 4                 # bias
                     + 2 * tile_b * O_pad * 4)       # output tile
    use_resident = ((not force_streaming)
                    and table_bytes <= 4 * 1024 * 1024
                    and resident_foot <= budget)

    tile_v = 256 if newgen else 128                  # MXU contraction depth
    if use_resident:
        V_pad = V_small_pad
        n_v = 1
    else:
        tile_v = min(tile_v, _round_up(max(V, 1), 128))
        V_pad = _round_up(max(V, 1), tile_v)
        n_v = V_pad // tile_v

    # Pad inputs. text padding uses -1 so padded slots never match any vocab
    # id (the kernel reads text in full 8-row slabs, including padded rows).
    text_p = jnp.full((S_pad, B_pad), -1, jnp.int32).at[:S, :B].set(
        text.astype(jnp.int32))
    emb_p = jnp.zeros((V_pad, E_pad), emb_dtype).at[:V, :E].set(
        emb_table.astype(emb_dtype))
    # fc weight pre-transposed to (E, O), bf16, with the 1/S mean folded in.
    w_t = jnp.zeros((E_pad, O_pad), jnp.bfloat16).at[:E, :O].set(
        (fc_weight.T / S).astype(jnp.bfloat16))
    b_p = jnp.zeros((1, O_pad), jnp.float32).at[0, :O].set(
        fc_bias.astype(jnp.float32))

    flops = int(2 * B_pad * V_pad * E_pad + 2 * B_pad * E_pad * O_pad)
    # Embedding table (and fc params) are re-streamed once per batch tile.
    bytes_accessed = int(n_b * V_pad * E_pad * emb_bytes
                         + S_pad * B_pad * 4
                         + n_b * max(n_v, 1) * (E_pad * O_pad * 2 + O_pad * 4)
                         + B_pad * O_pad * 4)

    if use_resident:
        vmem_needed = resident_foot
    else:
        vmem_needed = (2 * S_pad * tile_b * 4
                       + 2 * tile_v * E_pad * emb_bytes
                       + 2 * E_pad * O_pad * 2
                       + 2 * O_pad * 4
                       + 2 * tile_b * O_pad * 4
                       + tile_b * E_pad * 4)         # f32 pooled accumulator
    if vmem_needed > budget:
        raise ValueError(
            f"tile configuration needs ~{vmem_needed} B of VMEM but only "
            f"{budget} B is budgeted (capacity {vmem_cap} B); shrink tiles")
    vmem_limit = int(min(max(vmem_needed * 5 // 4, 16 * 1024 * 1024), budget))

    if use_resident:
        kernel = functools.partial(
            _fasttext_resident_kernel, n_s8=n_s8, n_sub=n_sub, sub_b=sub_b,
            counts_dtype=counts_dtype)
        out_p = pl.pallas_call(
            kernel,
            out_shape=jax.ShapeDtypeStruct((B_pad, O_pad), jnp.float32),
            grid_spec=pltpu.PrefetchScalarGridSpec(
                num_scalar_prefetch=0,
                grid=(n_b,),
                in_specs=[
                    pl.BlockSpec((S_pad, tile_b), lambda b: (0, b)),   # text
                    pl.BlockSpec((V_pad, E_pad), lambda b: (0, 0)),    # emb table
                    pl.BlockSpec((E_pad, O_pad), lambda b: (0, 0)),    # fc weight
                    pl.BlockSpec((1, O_pad), lambda b: (0, 0)),        # fc bias
                ],
                out_specs=pl.BlockSpec((tile_b, O_pad), lambda b: (b, 0)),
            ),
            compiler_params=pltpu.CompilerParams(
                dimension_semantics=("parallel",),
                vmem_limit_bytes=vmem_limit),
            cost_estimate=pl.CostEstimate(flops=flops, transcendentals=0,
                                          bytes_accessed=bytes_accessed),
        )(text_p, emb_p, w_t, b_p)
    else:
        kernel = functools.partial(
            _fasttext_streaming_kernel, n_s8=n_s8, n_sub=n_sub, sub_b=sub_b,
            counts_dtype=counts_dtype)
        out_p = pl.pallas_call(
            kernel,
            out_shape=jax.ShapeDtypeStruct((B_pad, O_pad), jnp.float32),
            grid_spec=pltpu.PrefetchScalarGridSpec(
                num_scalar_prefetch=0,
                grid=(n_b, n_v),                   # vocab reduction axis last
                in_specs=[
                    pl.BlockSpec((S_pad, tile_b), lambda b, v: (0, b)),  # text
                    pl.BlockSpec((tile_v, E_pad), lambda b, v: (v, 0)),  # emb tile
                    pl.BlockSpec((E_pad, O_pad), lambda b, v: (0, 0)),   # fc weight
                    pl.BlockSpec((1, O_pad), lambda b, v: (0, 0)),       # fc bias
                ],
                out_specs=pl.BlockSpec((tile_b, O_pad), lambda b, v: (b, 0)),
                scratch_shapes=[pltpu.VMEM((tile_b, E_pad), jnp.float32)],
            ),
            compiler_params=pltpu.CompilerParams(
                dimension_semantics=("parallel", "arbitrary"),
                vmem_limit_bytes=vmem_limit),
            cost_estimate=pl.CostEstimate(flops=flops, transcendentals=0,
                                          bytes_accessed=bytes_accessed),
        )(text_p, emb_p, w_t, b_p)

    return out_p[:B, :O]


def fasttext_reference(text, emb_table, fc_weight, fc_bias):
    embedded = emb_table[text]                     # (S, B, E)
    embedded = jnp.transpose(embedded, (1, 0, 2))  # (B, S, E)
    pooled = jnp.mean(embedded, axis=1)            # (B, E)
    return pooled @ fc_weight.T + fc_bias          # (B, O)


if __name__ == "__main__":
    # --- small config matching the module (resident-table fast path) ---
    vocab_size, embedding_dim, output_dim, pad_idx = 32, 32, 8, 0
    seq_len, batch = 8, 4

    key = jax.random.PRNGKey(0)
    k_emb, k_w, k_b, k_text = jax.random.split(key, 4)

    emb_table = jax.random.normal(k_emb, (vocab_size, embedding_dim), jnp.float32)
    emb_table = emb_table.at[pad_idx].set(0.0)      # padding_idx row is zero
    fc_weight = jax.random.normal(k_w, (output_dim, embedding_dim), jnp.float32) * 0.1
    fc_bias = jax.random.normal(k_b, (output_dim,), jnp.float32) * 0.1
    # text shaped (seq_len, batch), matching the PyTorch forward's permute(1,0,2).
    text = jax.random.randint(k_text, (seq_len, batch), 0, vocab_size, jnp.int32)

    out = jax.block_until_ready(
        fasttext_forward(text, emb_table, fc_weight, fc_bias))
    ref = fasttext_reference(text, emb_table, fc_weight, fc_bias)
    assert out.shape == (batch, output_dim)
    # Tolerance accounts for the bf16 embedding-table / fc-weight MXU operands
    # (f32 accumulation via preferred_element_type).
    assert jnp.allclose(out, ref, atol=3e-2, rtol=3e-2), (out, ref)

    # --- also exercise the streaming (large-vocab) path at a small size ---
    vocab2, emb2, out2_dim, seq2, batch2 = 512, 64, 16, 24, 12
    k_emb2, k_w2, k_b2, k_text2 = jax.random.split(jax.random.PRNGKey(0), 4)
    emb_table2 = jax.random.normal(k_emb2, (vocab2, emb2), jnp.float32)
    fc_weight2 = jax.random.normal(k_w2, (out2_dim, emb2), jnp.float32) * 0.1
    fc_bias2 = jax.random.normal(k_b2, (out2_dim,), jnp.float32) * 0.1
    text2 = jax.random.randint(k_text2, (seq2, batch2), 0, vocab2, jnp.int32)

    out2 = jax.block_until_ready(
        fasttext_forward(text2, emb_table2, fc_weight2, fc_bias2,
                         force_streaming=True))
    ref2 = fasttext_reference(text2, emb_table2, fc_weight2, fc_bias2)
    assert out2.shape == (batch2, out2_dim)
    assert jnp.allclose(out2, ref2, atol=3e-2, rtol=3e-2), (out2, ref2)

    print("KERNEL_OK")
</pallas_src>

<mosaic_0001>
module attributes {stable_mosaic.version = 11 : i64} {
  func.func @_fasttext_resident_kernel(%arg0: i32, %arg1: memref<8x8xi32, #tpu.memory_space<vmem>>, %arg2: memref<128x128xbf16, #tpu.memory_space<vmem>>, %arg3: memref<128x128xbf16, #tpu.memory_space<vmem>>, %arg4: memref<1x128xf32, #tpu.memory_space<vmem>>, %arg5: memref<8x128xf32, #tpu.memory_space<vmem>>) attributes {dimension_semantics = [#tpu.dimension_semantics<parallel>], iteration_bounds = array<i64: 1>, scalar_prefetch = 0 : i64, scratch_operands = 0 : i64, tpu.core_type = #tpu.core_type<tc>, window_params = [{transform_indices = @transform_0, window_bounds = array<i64: 8, 8>}, {pipeline_mode = #tpu.pipeline_mode<synchronous>, transform_indices = @transform_1, window_bounds = array<i64: 128, 128>}, {pipeline_mode = #tpu.pipeline_mode<synchronous>, transform_indices = @transform_2, window_bounds = array<i64: 128, 128>}, {pipeline_mode = #tpu.pipeline_mode<synchronous>, transform_indices = @transform_3, window_bounds = array<i64: 1, 128>}, {transform_indices = @transform_4, window_bounds = array<i64: 8, 128>}]} {
    %c0 = arith.constant 0 : index
    %c0_0 = arith.constant 0 : index
    %0 = vector.load %arg2[%c0, %c0_0] : memref<128x128xbf16, #tpu.memory_space<vmem>>, vector<128x128xbf16>
    %c0_1 = arith.constant 0 : index
    %c0_2 = arith.constant 0 : index
    %1 = vector.load %arg3[%c0_1, %c0_2] : memref<128x128xbf16, #tpu.memory_space<vmem>>, vector<128x128xbf16>
    %c0_3 = arith.constant 0 : index
    %c0_4 = arith.constant 0 : index
    %2 = vector.load %arg4[%c0_3, %c0_4] : memref<1x128xf32, #tpu.memory_space<vmem>>, vector<1x128xf32>
    %3 = tpu.iota {dimensions = array<i32: 0>} : vector<128x8xi32>
    %c0_i32 = arith.constant 0 : i32
    %4 = vector.broadcast %c0_i32 : i32 to vector<128x8xi32>
    %5 = arith.addi %4, %3 : vector<128x8xi32>
    %cst = arith.constant 0.000000e+00 : f32
    %6 = vector.broadcast %cst : f32 to vector<128x8xf32>
    %c0_i32_5 = arith.constant 0 : i32
    %c8_i32 = arith.constant 8 : i32
    %7 = arith.muli %c0_i32_5, %c8_i32 : i32
    %8 = tpu.assume_multiple %7, 8 : i32
    %9 = arith.index_cast %8 : i32 to index
    %c0_6 = arith.constant 0 : index
    %10 = vector.load %arg1[%9, %c0_6] : memref<8x8xi32, #tpu.memory_space<vmem>>, vector<8x8xi32>
    %11 = vector.extract_strided_slice %10 {offsets = [0, 0], sizes = [1, 8], strides = [1, 1]} : vector<8x8xi32> to vector<1x8xi32>
    %12 = vector.broadcast %11 : vector<1x8xi32> to vector<128x8xi32>
    %13 = arith.cmpi eq, %12, %5 : vector<128x8xi32>
    %14 = arith.extui %13 : vector<128x8xi1> to vector<128x8xi32>
    %15 = arith.sitofp %14 : vector<128x8xi32> to vector<128x8xf32>
    %16 = arith.addf %6, %15 : vector<128x8xf32>
    %17 = vector.extract_strided_slice %10 {offsets = [1, 0], sizes = [1, 8], strides = [1, 1]} : vector<8x8xi32> to vector<1x8xi32>
    %18 = vector.broadcast %17 : vector<1x8xi32> to vector<128x8xi32>
    %19 = arith.cmpi eq, %18, %5 : vector<128x8xi32>
    %20 = arith.extui %19 : vector<128x8xi1> to vector<128x8xi32>
    %21 = arith.sitofp %20 : vector<128x8xi32> to vector<128x8xf32>
    %22 = arith.addf %16, %21 : vector<128x8xf32>
    %23 = vector.extract_strided_slice %10 {offsets = [2, 0], sizes = [1, 8], strides = [1, 1]} : vector<8x8xi32> to vector<1x8xi32>
    %24 = vector.broadcast %23 : vector<1x8xi32> to vector<128x8xi32>
    %25 = arith.cmpi eq, %24, %5 : vector<128x8xi32>
    %26 = arith.extui %25 : vector<128x8xi1> to vector<128x8xi32>
    %27 = arith.sitofp %26 : vector<128x8xi32> to vector<128x8xf32>
    %28 = arith.addf %22, %27 : vector<128x8xf32>
    %29 = vector.extract_strided_slice %10 {offsets = [3, 0], sizes = [1, 8], strides = [1, 1]} : vector<8x8xi32> to vector<1x8xi32>
    %30 = vector.broadcast %29 : vector<1x8xi32> to vector<128x8xi32>
    %31 = arith.cmpi eq, %30, %5 : vector<128x8xi32>
    %32 = arith.extui %31 : vector<128x8xi1> to vector<128x8xi32>
    %33 = arith.sitofp %32 : vector<128x8xi32> to vector<128x8xf32>
    %34 = arith.addf %28, %33 : vector<128x8xf32>
    %35 = vector.extract_strided_slice %10 {offsets = [4, 0], sizes = [1, 8], strides = [1, 1]} : vector<8x8xi32> to vector<1x8xi32>
    %36 = vector.broadcast %35 : vector<1x8xi32> to vector<128x8xi32>
    %37 = arith.cmpi eq, %36, %5 : vector<128x8xi32>
    %38 = arith.extui %37 : vector<128x8xi1> to vector<128x8xi32>
    %39 = arith.sitofp %38 : vector<128x8xi32> to vector<128x8xf32>
    %40 = arith.addf %34, %39 : vector<128x8xf32>
    %41 = vector.extract_strided_slice %10 {offsets = [5, 0], sizes = [1, 8], strides = [1, 1]} : vector<8x8xi32> to vector<1x8xi32>
    %42 = vector.broadcast %41 : vector<1x8xi32> to vector<128x8xi32>
    %43 = arith.cmpi eq, %42, %5 : vector<128x8xi32>
    %44 = arith.extui %43 : vector<128x8xi1> to vector<128x8xi32>
    %45 = arith.sitofp %44 : vector<128x8xi32> to vector<128x8xf32>
    %46 = arith.addf %40, %45 : vector<128x8xf32>
    %47 = vector.extract_strided_slice %10 {offsets = [6, 0], sizes = [1, 8], strides = [1, 1]} : vector<8x8xi32> to vector<1x8xi32>
    %48 = vector.broadcast %47 : vector<1x8xi32> to vector<128x8xi32>
    %49 = arith.cmpi eq, %48, %5 : vector<128x8xi32>
    %50 = arith.extui %49 : vector<128x8xi1> to vector<128x8xi32>
    %51 = arith.sitofp %50 : vector<128x8xi32> to vector<128x8xf32>
    %52 = arith.addf %46, %51 : vector<128x8xf32>
    %53 = vector.extract_strided_slice %10 {offsets = [7, 0], sizes = [1, 8], strides = [1, 1]} : vector<8x8xi32> to vector<1x8xi32>
    %54 = vector.broadcast %53 : vector<1x8xi32> to vector<128x8xi32>
    %55 = arith.cmpi eq, %54, %5 : vector<128x8xi32>
    %56 = arith.extui %55 : vector<128x8xi1> to vector<128x8xi32>
    %57 = arith.sitofp %56 : vector<128x8xi32> to vector<128x8xf32>
    %58 = arith.addf %52, %57 : vector<128x8xf32>
    %c1_i32 = arith.constant 1 : i32
    %59 = arith.truncf %58 : vector<128x8xf32> to vector<128x8xbf16>
    %cst_7 = arith.constant dense<0.000000e+00> : vector<8x128xf32>
    %60 = tpu.matmul %59, %0, %cst_7 {dimension_numbers = #tpu.dot_dimension_numbers<[0], [0], [1], [1], [0, 1, 1, 1], [], []>} : vector<128x8xbf16>, vector<128x128xbf16>, vector<8x128xf32> -> vector<8x128xf32>
    %61 = arith.truncf %60 : vector<8x128xf32> to vector<8x128xbf16>
    %cst_8 = arith.constant dense<0.000000e+00> : vector<8x128xf32>
    %62 = tpu.matmul %61, %1, %cst_8 {dimension_numbers = #tpu.dot_dimension_numbers<[1], [0], [0], [1], [0, 0, 1, 1], [], []>} : vector<8x128xbf16>, vector<128x128xbf16>, vector<8x128xf32> -> vector<8x128xf32>
    %63 = vector.broadcast %2 : vector<1x128xf32> to vector<8x128xf32>
    %64 = arith.addf %62, %63 : vector<8x128xf32>
    %c0_9 = arith.constant 0 : index
    %c0_10 = arith.constant 0 : index
    %65 = vector.load %arg5[%c0_9, %c0_10] : memref<8x128xf32, #tpu.memory_space<vmem>>, vector<8x128xf32>
    tpu.vector_store %arg5[%c0_9, %c0_10], %64 {strides = array<i32>} : memref<8x128xf32, #tpu.memory_space<vmem>>, vector<8x128xf32>,
    return
  }
  func.func @transform_0(%arg0: i32) -> (i32, i32) {
    %c0_i32 = arith.constant 0 : i32
    %c0_i32_0 = arith.constant 0 : i32
    return %c0_i32, %arg0 : i32, i32
  }
  func.func @transform_1(%arg0: i32) -> (i32, i32) {
    %c0_i32 = arith.constant 0 : i32
    %c0_i32_0 = arith.constant 0 : i32
    %c0_i32_1 = arith.constant 0 : i32
    return %c0_i32, %c0_i32_0 : i32, i32
  }
  func.func @transform_2(%arg0: i32) -> (i32, i32) {
    %c0_i32 = arith.constant 0 : i32
    %c0_i32_0 = arith.constant 0 : i32
    %c0_i32_1 = arith.constant 0 : i32
    return %c0_i32, %c0_i32_0 : i32, i32
  }
  func.func @transform_3(%arg0: i32) -> (i32, i32) {
    %c0_i32 = arith.constant 0 : i32
    %c0_i32_0 = arith.constant 0 : i32
    %c0_i32_1 = arith.constant 0 : i32
    return %c0_i32, %c0_i32_0 : i32, i32
  }
  func.func @transform_4(%arg0: i32) -> (i32, i32) {
    %c0_i32 = arith.constant 0 : i32
    %c0_i32_0 = arith.constant 0 : i32
    return %arg0, %c0_i32 : i32, i32
  }
}

</mosaic_0001>

<bundles_post_ra>
// kernel: tpu_custom_call.1
= control target key start
LH: loop header
LB: loop body
LE: loop exit
PB: predicated region body
PF: predicated region fallthrough
CT: control target
= control target key end

     0   :  { %9 = vsyncpa [#allocation3], 0  ;;  %s1666_s0 = inlined_call_operand.hbm [shape: s32[8,8], index: 0, kind: input, shape index: {}]   ;;  %s1667_s1 = inlined_call_operand.hbm [shape: bf16[128,128], index: 1, kind: input, shape index: {}]   ;;  %s1668_s2 = inlined_call_operand.hbm [shape: bf16[128,128], index: 2, kind: input, shape index: {}]   ;;  %s1669_s3 = inlined_call_operand.vmem [shape: f32[1,128], index: 3, kind: input, shape index: {}]   ;;  %s1670_s4 = inlined_call_operand.hbm [shape: f32[8,128], index: 4, kind: output, shape index: {}]  }
   0x1   :  { %10 = vsyncpa [#allocation6], 0 }
   0x2   :  { %11 = vsyncpa [#allocation4], 0  ;;  %s1190_s15 = smov [#allocation5]  }
   0x3   :  { %s27_s16 = sshll.u32 %s1190_s15, 4  ;;  %s28_s16 = int_to_ptr.vmem [resolvable:$true] %s27_s16 }
   0x4   :  { %s1112_s17 = scalar_lea.vmem %s28_s16, 1024  ;;  %p1117_p1 = scmp.lt.s32.totalorder %s28_s16, %s28_s16 }
   0x5   :  { %p1113_p0 = scmp.ne.s32.totalorder %s28_s16, %s1112_s17  ;;  %p1118_p2 = scmp.lt.s32.totalorder %s1112_s17, %s1112_s17 }
   0x7   :  { %p1119_p3 = por %p1118_p2, %p1117_p1 }
   0x9   :  { %p1120_p4 = pnand %p1119_p3, %p1113_p0 }
   0xb   :  { %1123 = shalt.err (!%p1120_p4)
}
   0xc   :  { %s1191_s18 = smov 64   ;;  %s1192_s19 = smov 4  }
   0xd   :  { %33 = dma.hbm_to_vmem [thread:$0]  %s1667_s1, 1024, %s28_s16, [#allocation6], %s1191_s18, %s1191_s18, %s1192_s19  }
   0xe   :  { %s1193_s22 = smov [#allocation2]   ;;  %s1194_s24 = smov [#allocation7]  }
   0xf   :  { %s18_s23 = sshll.u32 %s1193_s22, 4  ;;  %s39_s25 = sshll.u32 %s1194_s24, 4  ;;  %s19_s23 = int_to_ptr.vmem [resolvable:$true] %s18_s23  ;;  %s40_s25 = int_to_ptr.vmem [resolvable:$true] %s39_s25 }
  0x10   :  { %s1132_s26 = scalar_lea.vmem %s19_s23, 128  ;;  %p1137_p6 = scmp.lt.s32.totalorder %s19_s23, %s19_s23 }
  0x11   :  { %p1133_p5 = scmp.ne.s32.totalorder %s19_s23, %s1132_s26  ;;  %p1138_p7 = scmp.lt.s32.totalorder %s1132_s26, %s1132_s26 }
  0x13   :  { %p1139_p8 = por %p1138_p7, %p1137_p6 }
  0x15   :  { %p1140_p9 = pnand %p1139_p8, %p1133_p5 }
  0x17   :  { %1143 = shalt.err (!%p1140_p9)
}
  0x18   :  { %21 = dma.hbm_to_vmem [thread:$0]  %s1666_s0, 128, %s19_s23, [#allocation3]  }
  0x19   :  { %s1152_s29 = scalar_lea.vmem %s40_s25, 1024  ;;  %p1157_p11 = scmp.lt.s32.totalorder %s40_s25, %s40_s25 }
  0x1a   :  { %p1153_p10 = scmp.ne.s32.totalorder %s40_s25, %s1152_s29  ;;  %p1158_p12 = scmp.lt.s32.totalorder %s1152_s29, %s1152_s29 }
  0x1c   :  { %p1159_p13 = por %p1158_p12, %p1157_p11 }
  0x1e   :  { %p1160_p0 = pnand %p1159_p13, %p1153_p10 }
  0x20   :  { %1163 = shalt.err (!%p1160_p0)
}
  0x21   :  { %45 = dma.hbm_to_vmem [thread:$0]  %s1668_s2, 1024, %s40_s25, [#allocation6], %s1191_s18, %s1191_s18, %s1192_s19  }
  0x22   :  { %1184 = dma.done.wait [#allocation3], 128  }
  0x23   :  { %1185 = vsyncadd [#allocation3], 4294967168 }
  0x24   :  { %1186 = dma.done.wait [#allocation6], 2048  }
  0x25   :  { %1187 = vsyncadd [#allocation6], 4294965248  ;;  %v91_v0 = vlaneseq  ;;  %v1195_v1 = vmov 0.0   ;;  %v108_v15 = vld [vmem:[#allocation2] sm:$0xff]  ;;  %v1089_v29 = vld [vmem:[#allocation5 + $0x30] sm:$0xff]   ;;  %s1197_s5 = smov [#allocation8]  }
  0x26   :  { %1040 = vmatprep.subr.bf16.mxu0 %v1195_v1  ;;  %1060 = vmatprep.subr.bf16.mxu1 %v1195_v1  ;;  %v1088_v20 = vld [vmem:[#allocation5 + $0x38] sm:$0xff]   ;;  %v1090_v38 = vld [vmem:[#allocation5 + $0x28] sm:$0xff]   ;;  %v1091_v47 = vld [vmem:[#allocation5 + $0x20] sm:$0xff]   ;;  %s867_s6 = sshll.u32 %s1197_s5, 4  ;;  %s868_s6 = int_to_ptr.vmem [resolvable:$true] %s867_s6 }
  0x27   :  { %v1234_v2 = vshrl.u32 %v91_v0, 7  ;;  %1041 = vmatpush3.bf16.msra.mxu0 %v1088_v20  ;;  %v1092_v54 = vld [vmem:[#allocation5 + $0x18] sm:$0xff]   ;;  %s1164_s7 = scalar_lea.vmem %s868_s6, 128  ;;  %p1169_p2 = scmp.lt.s32.totalorder %s868_s6, %s868_s6 }
  0x28   :  { %1042 = vmatprep.subr.bf16.mxu0 %v1195_v1  ;;  %p1165_p1 = scmp.ne.s32.totalorder %s868_s6, %s1164_s7  ;;  %p1170_p3 = scmp.lt.s32.totalorder %s1164_s7, %s1164_s7 }
  0x29   :  { %v1237_v3 = vadd.s32 8, %v1234_v2  ;;  %v111_v4 = vsub.s32 0, %v1234_v2  ;;  %v179_v5 = vsub.s32 1, %v1234_v2  ;;  %v247_v6 = vsub.s32 2, %v1234_v2 }
  0x2a   :  { %v315_v7 = vsub.s32 3, %v1234_v2  ;;  %v383_v8 = vsub.s32 4, %v1234_v2  ;;  %v451_v9 = vsub.s32 5, %v1234_v2  ;;  %v519_v10 = vsub.s32 6, %v1234_v2  ;;  %p1171_p4 = por %p1170_p3, %p1169_p2 }
  0x2b   :  { %v587_v11 = vsub.s32 7, %v1234_v2  ;;  %v1248_v12 = vadd.s32 16, %v1234_v2  ;;  %v1251_v13 = vadd.s32 24, %v1234_v2  ;;  %v1254_v14 = vadd.s32 32, %v1234_v2  ;;  %1043 = vmatpush3.bf16.msra.mxu0 %v1089_v29 }
  0x2c   :  { %v1257_v16 = vadd.s32 40, %v1234_v2  ;;  %v1260_v17 = vadd.s32 48, %v1234_v2  ;;  %v1263_v18 = vadd.s32 56, %v1234_v2  ;;  %v1266_v19 = vadd.s32 64, %v1234_v2  ;;  %1044 = vmatprep.subr.bf16.mxu0 %v1195_v1  ;;  %p1172_p5 = pnand %p1171_p4, %p1165_p1 }
  0x2d   :  { %v1268_v21 = vrot.slane %v108_v15, %v111_v4  ;;  %v1270_v22 = vrot.slane %v108_v15, %v179_v5  ;;  %v1272_v23 = vrot.slane %v108_v15, %v247_v6  ;;  %v1274_v24 = vrot.slane %v108_v15, %v315_v7 }
  0x2e   :  { %v1276_v25 = vrot.slane %v108_v15, %v383_v8  ;;  %v1278_v26 = vrot.slane %v108_v15, %v451_v9  ;;  %v1280_v27 = vrot.slane %v108_v15, %v519_v10  ;;  %v1282_v28 = vrot.slane %v108_v15, %v587_v11  ;;  %v1093_v11 = vld [vmem:[#allocation5 + $0x10] sm:$0xff]  }
  0x2f   :  { %vm113_vm0 = vcmp.eq.s32.totalorder %v1268_v21, %v1234_v2  ;;  %vm114_vm1 = vcmp.eq.s32.totalorder %v1268_v21, %v1237_v3  ;;  %vm181_vm2 = vcmp.eq.s32.totalorder %v1270_v22, %v1234_v2  ;;  %vm182_vm3 = vcmp.eq.s32.totalorder %v1270_v22, %v1237_v3  ;;  %1045 = vmatpush3.bf16.msra.mxu0 %v1090_v38  ;;  %v1094_v38 = vld [vmem:[#allocation5 + $0x8] sm:$0xff]  }
  0x30   :  { %v877_v30 = vsel %vm113_vm0, 1.0, %v1195_v1  ;;  %v878_v31 = vsel %vm114_vm1, 1.0, %v1195_v1  ;;  %v893_v32 = vsel %vm181_vm2, 1.0, %v1195_v1  ;;  %v894_v33 = vsel %vm182_vm3, 1.0, %v1195_v1  ;;  %1046 = vmatprep.subr.bf16.mxu0 %v1195_v1 }
  0x31   :  { %v229_v34 = vadd.f32 %v893_v32, %v877_v30  ;;  %v230_v35 = vadd.f32 %v894_v33, %v878_v31  ;;  %vm249_vm4 = vcmp.eq.s32.totalorder %v1272_v23, %v1234_v2  ;;  %vm250_vm5 = vcmp.eq.s32.totalorder %v1272_v23, %v1237_v3 }
  0x32   :  { %v909_v36 = vsel %vm249_vm4, 1.0, %v1195_v1  ;;  %v910_v37 = vsel %vm250_vm5, 1.0, %v1195_v1  ;;  %vm317_vm6 = vcmp.eq.s32.totalorder %v1274_v24, %v1234_v2  ;;  %vm318_vm7 = vcmp.eq.s32.totalorder %v1274_v24, %v1237_v3 }
  0x33   :  { %v297_v39 = vadd.f32 %v909_v36, %v229_v34  ;;  %v298_v40 = vadd.f32 %v910_v37, %v230_v35  ;;  %v925_v41 = vsel %vm317_vm6, 1.0, %v1195_v1  ;;  %v926_v42 = vsel %vm318_vm7, 1.0, %v1195_v1  ;;  %1047 = vmatpush3.bf16.msra.mxu0 %v1091_v47  ;;  %v1095_v47 = vld [vmem:[#allocation5] sm:$0xff]  }
  0x34   :  { %vm385_vm8 = vcmp.eq.s32.totalorder %v1276_v25, %v1234_v2  ;;  %vm386_vm9 = vcmp.eq.s32.totalorder %v1276_v25, %v1237_v3  ;;  %vm453_vm10 = vcmp.eq.s32.totalorder %v1278_v26, %v1234_v2  ;;  %vm454_vm11 = vcmp.eq.s32.totalorder %v1278_v26, %v1237_v3  ;;  %1048 = vmatprep.subr.bf16.mxu0 %v1195_v1 }
  0x35   :  { %v365_v43 = vadd.f32 %v925_v41, %v297_v39  ;;  %v366_v44 = vadd.f32 %v926_v42, %v298_v40  ;;  %v941_v45 = vsel %vm385_vm8, 1.0, %v1195_v1  ;;  %v942_v46 = vsel %vm386_vm9, 1.0, %v1195_v1 }
  0x36   :  { %v957_v48 = vsel %vm453_vm10, 1.0, %v1195_v1  ;;  %v958_v49 = vsel %vm454_vm11, 1.0, %v1195_v1  ;;  %vm521_vm12 = vcmp.eq.s32.totalorder %v1280_v27, %v1234_v2  ;;  %vm522_vm13 = vcmp.eq.s32.totalorder %v1280_v27, %v1237_v3 }
  0x37   :  { %v433_v50 = vadd.f32 %v941_v45, %v365_v43  ;;  %v434_v51 = vadd.f32 %v942_v46, %v366_v44  ;;  %v973_v52 = vsel %vm521_vm12, 1.0, %v1195_v1  ;;  %v974_v53 = vsel %vm522_vm13, 1.0, %v1195_v1  ;;  %1049 = vmatpush3.bf16.msra.mxu0 %v1092_v54 }
  0x38   :  { %vm589_vm14 = vcmp.eq.s32.totalorder %v1282_v28, %v1234_v2  ;;  %vm590_vm15 = vcmp.eq.s32.totalorder %v1282_v28, %v1237_v3  ;;  %vm115_vm0 = vcmp.eq.s32.totalorder %v1268_v21, %v1248_v12  ;;  %vm116_vm1 = vcmp.eq.s32.totalorder %v1268_v21, %v1251_v13  ;;  %1050 = vmatprep.subr.bf16.mxu0 %v1195_v1 }
  0x39   :  { %v501_v55 = vadd.f32 %v957_v48, %v433_v50  ;;  %v502_v56 = vadd.f32 %v958_v49, %v434_v51  ;;  %v989_v57 = vsel %vm589_vm14, 1.0, %v1195_v1  ;;  %v990_v58 = vsel %vm590_vm15, 1.0, %v1195_v1 }
  0x3a   :  { %v879_v59 = vsel %vm115_vm0, 1.0, %v1195_v1  ;;  %v880_v60 = vsel %vm116_vm1, 1.0, %v1195_v1  ;;  %vm183_vm2 = vcmp.eq.s32.totalorder %v1270_v22, %v1248_v12  ;;  %vm184_vm3 = vcmp.eq.s32.totalorder %v1270_v22, %v1251_v13 }
  0x3b   :  { %v569_v61 = vadd.f32 %v973_v52, %v501_v55  ;;  %v570_v62 = vadd.f32 %v974_v53, %v502_v56  ;;  %v895_v63 = vsel %vm183_vm2, 1.0, %v1195_v1  ;;  %v896_v0 = vsel %vm184_vm3, 1.0, %v1195_v1  ;;  %1051 = vmatpush3.bf16.msra.mxu0 %v1093_v11 }
  0x3c   :  { %v231_v3 = vadd.f32 %v895_v63, %v879_v59  ;;  %v232_v4 = vadd.f32 %v896_v0, %v880_v60  ;;  %vm251_vm4 = vcmp.eq.s32.totalorder %v1272_v23, %v1248_v12  ;;  %vm252_vm5 = vcmp.eq.s32.totalorder %v1272_v23, %v1251_v13  ;;  %1052 = vmatprep.subr.bf16.mxu0 %v1195_v1 }
  0x3d   :  { %v637_v5 = vadd.f32 %v989_v57, %v569_v61  ;;  %v638_v6 = vadd.f32 %v990_v58, %v570_v62  ;;  %v911_v7 = vsel %vm251_vm4, 1.0, %v1195_v1  ;;  %v912_v8 = vsel %vm252_vm5, 1.0, %v1195_v1 }
  0x3e   :  { %v299_v9 = vadd.f32 %v911_v7, %v231_v3  ;;  %v300_v10 = vadd.f32 %v912_v8, %v232_v4  ;;  %vm319_vm6 = vcmp.eq.s32.totalorder %v1274_v24, %v1248_v12  ;;  %vm320_vm7 = vcmp.eq.s32.totalorder %v1274_v24, %v1251_v13 }
  0x3f   :  { %v653_v15 = vpack.c.bf16 %v638_v6, %v637_v5  ;;  %v927_v20 = vsel %vm319_vm6, 1.0, %v1195_v1  ;;  %v928_v29 = vsel %vm320_vm7, 1.0, %v1195_v1  ;;  %vm387_vm8 = vcmp.eq.s32.totalorder %v1276_v25, %v1248_v12  ;;  %1053 = vmatpush3.bf16.msra.mxu0 %v1094_v38 }
  0x40   :  { %v367_v30 = vadd.f32 %v927_v20, %v299_v9  ;;  %v368_v31 = vadd.f32 %v928_v29, %v300_v10  ;;  %vm388_vm9 = vcmp.eq.s32.totalorder %v1276_v25, %v1251_v13  ;;  %v943_v32 = vsel %vm387_vm8, 1.0, %v1195_v1  ;;  %1054 = vmatprep.subr.bf16.mxu0 %v1195_v1 }
  0x41   :  { %661 = vxpose.xlu0.c.b16.start [1/8] (narrow) %v653_v15, 16  ;;  %v944_v33 = vsel %vm388_vm9, 1.0, %v1195_v1  ;;  %vm455_vm10 = vcmp.eq.s32.totalorder %v1278_v26, %v1248_v12  ;;  %vm456_vm11 = vcmp.eq.s32.totalorder %v1278_v26, %v1251_v13  ;;  %vm523_vm12 = vcmp.eq.s32.totalorder %v1280_v27, %v1248_v12 }
  0x42   :  { %v435_v34 = vadd.f32 %v943_v32, %v367_v30  ;;  %v436_v35 = vadd.f32 %v944_v33, %v368_v31  ;;  %v959_v36 = vsel %vm455_vm10, 1.0, %v1195_v1  ;;  %v960_v37 = vsel %vm456_vm11, 1.0, %v1195_v1 }
  0x43   :  { %vm524_vm13 = vcmp.eq.s32.totalorder %v1280_v27, %v1251_v13  ;;  %v975_v39 = vsel %vm523_vm12, 1.0, %v1195_v1  ;;  %vm591_vm14 = vcmp.eq.s32.totalorder %v1282_v28, %v1248_v12  ;;  %vm592_vm15 = vcmp.eq.s32.totalorder %v1282_v28, %v1251_v13  ;;  %1055 = vmatpush3.bf16.msra.mxu0 %v1095_v47 }
  0x44   :  { %v503_v40 = vadd.f32 %v959_v36, %v435_v34  ;;  %v504_v41 = vadd.f32 %v960_v37, %v436_v35  ;;  %v976_v42 = vsel %vm524_vm13, 1.0, %v1195_v1  ;;  %v991_v43 = vsel %vm591_vm14, 1.0, %v1195_v1 }
  0x45   :  { %v992_v44 = vsel %vm592_vm15, 1.0, %v1195_v1  ;;  %vm117_vm0 = vcmp.eq.s32.totalorder %v1268_v21, %v1254_v14  ;;  %vm118_vm1 = vcmp.eq.s32.totalorder %v1268_v21, %v1257_v16  ;;  %vm185_vm2 = vcmp.eq.s32.totalorder %v1270_v22, %v1254_v14 }
  0x46   :  { %v571_v12 = vadd.f32 %v975_v39, %v503_v40  ;;  %v572_v13 = vadd.f32 %v976_v42, %v504_v41  ;;  %v881_v45 = vsel %vm117_vm0, 1.0, %v1195_v1  ;;  %v882_v46 = vsel %vm118_vm1, 1.0, %v1195_v1 }
  0x47   :  { %vm186_vm3 = vcmp.eq.s32.totalorder %v1270_v22, %v1257_v16  ;;  %v897_v48 = vsel %vm185_vm2, 1.0, %v1195_v1  ;;  %vm253_vm4 = vcmp.eq.s32.totalorder %v1272_v23, %v1254_v14  ;;  %vm254_vm5 = vcmp.eq.s32.totalorder %v1272_v23, %v1257_v16 }
  0x48   :  { %v639_v49 = vadd.f32 %v991_v43, %v571_v12  ;;  %v640_v50 = vadd.f32 %v992_v44, %v572_v13  ;;  %v898_v51 = vsel %vm186_vm3, 1.0, %v1195_v1  ;;  %v233_v52 = vadd.f32 %v897_v48, %v881_v45 }
  0x49   :  { %v234_v53 = vadd.f32 %v898_v51, %v882_v46  ;;  %v913_v54 = vsel %vm253_vm4, 1.0, %v1195_v1  ;;  %v914_v55 = vsel %vm254_vm5, 1.0, %v1195_v1  ;;  %vm321_vm6 = vcmp.eq.s32.totalorder %v1274_v24, %v1254_v14 }
  0x4a   :  { %v654_v56 = vpack.c.bf16 %v640_v50, %v639_v49  ;;  %v301_v57 = vadd.f32 %v913_v54, %v233_v52  ;;  %vm322_vm7 = vcmp.eq.s32.totalorder %v1274_v24, %v1257_v16  ;;  %v929_v58 = vsel %vm321_vm6, 1.0, %v1195_v1 }
  0x4b   :  { %v302_v59 = vadd.f32 %v914_v55, %v234_v53  ;;  %v930_v60 = vsel %vm322_vm7, 1.0, %v1195_v1  ;;  %vm389_vm8 = vcmp.eq.s32.totalorder %v1276_v25, %v1254_v14  ;;  %vm390_vm9 = vcmp.eq.s32.totalorder %v1276_v25, %v1257_v16 }
  0x4c   :  { %662 = vxpose.xlu0.c.b16.cont [2/8] (narrow) %v654_v56, 16  ;;  %v369_v61 = vadd.f32 %v929_v58, %v301_v57  ;;  %v945_v62 = vsel %vm389_vm8, 1.0, %v1195_v1  ;;  %v946_v63 = vsel %vm390_vm9, 1.0, %v1195_v1  ;;  %vm457_vm10 = vcmp.eq.s32.totalorder %v1278_v26, %v1254_v14  ;;  %v1096_v56 = vld [vmem:[#allocation7 + $0x38] sm:$0xff]   ;;  %v1097_v58 = vld [vmem:[#allocation7 + $0x30] sm:$0xff]  }
  0x4d   :  { %v370_v0 = vadd.f32 %v930_v60, %v302_v59  ;;  %vm458_vm11 = vcmp.eq.s32.totalorder %v1278_v26, %v1257_v16  ;;  %v961_v3 = vsel %vm457_vm10, 1.0, %v1195_v1  ;;  %vm525_vm12 = vcmp.eq.s32.totalorder %v1280_v27, %v1254_v14  ;;  %1061 = vmatpush3.bf16.msra.mxu1 %v1096_v56 }
  0x4e   :  { %v437_v4 = vadd.f32 %v945_v62, %v369_v61  ;;  %v962_v5 = vsel %vm458_vm11, 1.0, %v1195_v1  ;;  %vm526_vm13 = vcmp.eq.s32.totalorder %v1280_v27, %v1257_v16  ;;  %v977_v6 = vsel %vm525_vm12, 1.0, %v1195_v1  ;;  %1062 = vmatprep.subr.bf16.mxu1 %v1195_v1 }
  0x4f   :  { %v438_v7 = vadd.f32 %v946_v63, %v370_v0  ;;  %v978_v8 = vsel %vm526_vm13, 1.0, %v1195_v1  ;;  %vm593_vm14 = vcmp.eq.s32.totalorder %v1282_v28, %v1254_v14  ;;  %vm594_vm15 = vcmp.eq.s32.totalorder %v1282_v28, %v1257_v16 }
  0x50   :  { %v505_v9 = vadd.f32 %v961_v3, %v437_v4  ;;  %v993_v10 = vsel %vm593_vm14, 1.0, %v1195_v1  ;;  %v994_v11 = vsel %vm594_vm15, 1.0, %v1195_v1  ;;  %vm119_vm0 = vcmp.eq.s32.totalorder %v1268_v21, %v1260_v17 }
  0x51   :  { %v506_v15 = vadd.f32 %v962_v5, %v438_v7  ;;  %vm120_vm1 = vcmp.eq.s32.totalorder %v1268_v21, %v1263_v18  ;;  %v883_v20 = vsel %vm119_vm0, 1.0, %v1195_v1  ;;  %vm187_vm2 = vcmp.eq.s32.totalorder %v1270_v22, %v1260_v17  ;;  %1063 = vmatpush3.bf16.msra.mxu1 %v1097_v58 }
  0x52   :  { %v573_v14 = vadd.f32 %v977_v6, %v505_v9  ;;  %v884_v16 = vsel %vm120_vm1, 1.0, %v1195_v1  ;;  %vm188_vm3 = vcmp.eq.s32.totalorder %v1270_v22, %v1263_v18  ;;  %v899_v29 = vsel %vm187_vm2, 1.0, %v1195_v1  ;;  %1064 = vmatprep.subr.bf16.mxu1 %v1195_v1 }
  0x53   :  { %v574_v30 = vadd.f32 %v978_v8, %v506_v15  ;;  %v900_v31 = vsel %vm188_vm3, 1.0, %v1195_v1  ;;  %v235_v32 = vadd.f32 %v899_v29, %v883_v20  ;;  %vm255_vm4 = vcmp.eq.s32.totalorder %v1272_v23, %v1260_v17 }
  0x54   :  { %v641_v33 = vadd.f32 %v993_v10, %v573_v14  ;;  %v236_v34 = vadd.f32 %v900_v31, %v884_v16  ;;  %vm256_vm5 = vcmp.eq.s32.totalorder %v1272_v23, %v1263_v18  ;;  %v915_v35 = vsel %vm255_vm4, 1.0, %v1195_v1  ;;  %v1098_v10 = vld [vmem:[#allocation7 + $0x28] sm:$0xff]  }
  0x55   :  { %v642_v36 = vadd.f32 %v994_v11, %v574_v30  ;;  %v916_v37 = vsel %vm256_vm5, 1.0, %v1195_v1  ;;  %v303_v38 = vadd.f32 %v915_v35, %v235_v32  ;;  %vm323_vm6 = vcmp.eq.s32.totalorder %v1274_v24, %v1260_v17  ;;  %1065 = vmatpush3.bf16.msra.mxu1 %v1098_v10 }
  0x56   :  { %v304_v39 = vadd.f32 %v916_v37, %v236_v34  ;;  %vm324_vm7 = vcmp.eq.s32.totalorder %v1274_v24, %v1263_v18  ;;  %v931_v40 = vsel %vm323_vm6, 1.0, %v1195_v1  ;;  %vm391_vm8 = vcmp.eq.s32.totalorder %v1276_v25, %v1260_v17  ;;  %v1099_v34 = vld [vmem:[#allocation7 + $0x20] sm:$0xff]   ;;  %1066 = vmatprep.subr.bf16.mxu1 %v1195_v1 }
  0x57   :  { %v655_v41 = vpack.c.bf16 %v642_v36, %v641_v33  ;;  %v932_v42 = vsel %vm324_vm7, 1.0, %v1195_v1  ;;  %v371_v43 = vadd.f32 %v931_v40, %v303_v38  ;;  %vm392_vm9 = vcmp.eq.s32.totalorder %v1276_v25, %v1263_v18 }
  0x58   :  { %v372_v44 = vadd.f32 %v932_v42, %v304_v39  ;;  %v947_v12 = vsel %vm391_vm8, 1.0, %v1195_v1  ;;  %v948_v13 = vsel %vm392_vm9, 1.0, %v1195_v1  ;;  %vm459_vm10 = vcmp.eq.s32.totalorder %v1278_v26, %v1260_v17 }
  0x59   :  { %663 = vxpose.xlu0.c.b16.cont [3/8] (narrow) %v655_v41, 16  ;;  %v439_v45 = vadd.f32 %v947_v12, %v371_v43  ;;  %vm460_vm11 = vcmp.eq.s32.totalorder %v1278_v26, %v1263_v18  ;;  %v963_v46 = vsel %vm459_vm10, 1.0, %v1195_v1  ;;  %vm527_vm12 = vcmp.eq.s32.totalorder %v1280_v27, %v1260_v17  ;;  %1067 = vmatpush3.bf16.msra.mxu1 %v1099_v34  ;;  %v1100_v12 = vld [vmem:[#allocation7 + $0x18] sm:$0xff]  }
  0x5a   :  { %v440_v47 = vadd.f32 %v948_v13, %v372_v44  ;;  %v964_v48 = vsel %vm460_vm11, 1.0, %v1195_v1  ;;  %vm528_vm13 = vcmp.eq.s32.totalorder %v1280_v27, %v1263_v18  ;;  %v979_v49 = vsel %vm527_vm12, 1.0, %v1195_v1  ;;  %1068 = vmatprep.subr.bf16.mxu1 %v1195_v1 }
  0x5b   :  { %v507_v50 = vadd.f32 %v963_v46, %v439_v45  ;;  %v980_v51 = vsel %vm528_vm13, 1.0, %v1195_v1  ;;  %vm595_vm14 = vcmp.eq.s32.totalorder %v1282_v28, %v1260_v17  ;;  %vm596_vm15 = vcmp.eq.s32.totalorder %v1282_v28, %v1263_v18 }
  0x5c   :  { %v508_v52 = vadd.f32 %v964_v48, %v440_v47  ;;  %v995_v53 = vsel %vm595_vm14, 1.0, %v1195_v1  ;;  %v996_v54 = vsel %vm596_vm15, 1.0, %v1195_v1  ;;  %v101_v55 = vadd.s32 72, %v1234_v2 }
  0x5d   :  { %v575_v57 = vadd.f32 %v979_v49, %v507_v50  ;;  %vm121_vm0 = vcmp.eq.s32.totalorder %v1268_v21, %v1266_v19  ;;  %vm189_vm1 = vcmp.eq.s32.totalorder %v1270_v22, %v1266_v19  ;;  %vm257_vm2 = vcmp.eq.s32.totalorder %v1272_v23, %v1266_v19  ;;  %1069 = vmatpush3.bf16.msra.mxu1 %v1100_v12 }
  0x5e   :  { %v576_v17 = vadd.f32 %v980_v51, %v508_v52  ;;  %vm122_vm3 = vcmp.eq.s32.totalorder %v1268_v21, %v101_v55  ;;  %v885_v18 = vsel %vm121_vm0, 1.0, %v1195_v1  ;;  %vm190_vm4 = vcmp.eq.s32.totalorder %v1270_v22, %v101_v55  ;;  %1070 = vmatprep.subr.bf16.mxu1 %v1195_v1 }
  0x5f   :  { %v643_v59 = vadd.f32 %v995_v53, %v575_v57  ;;  %v886_v60 = vsel %vm122_vm3, 1.0, %v1195_v1  ;;  %v901_v61 = vsel %vm189_vm1, 1.0, %v1195_v1  ;;  %v902_v62 = vsel %vm190_vm4, 1.0, %v1195_v1 }
  0x60   :  { %v644_v63 = vadd.f32 %v996_v54, %v576_v17  ;;  %v237_v0 = vadd.f32 %v901_v61, %v885_v18  ;;  %v238_v3 = vadd.f32 %v902_v62, %v886_v60  ;;  %vm258_vm5 = vcmp.eq.s32.totalorder %v1272_v23, %v101_v55 }
  0x61   :  { %v917_v4 = vsel %vm257_vm2, 1.0, %v1195_v1  ;;  %v918_v5 = vsel %vm258_vm5, 1.0, %v1195_v1  ;;  %vm325_vm6 = vcmp.eq.s32.totalorder %v1274_v24, %v1266_v19  ;;  %vm326_vm7 = vcmp.eq.s32.totalorder %v1274_v24, %v101_v55 }
  0x62   :  { %v656_v6 = vpack.c.bf16 %v644_v63, %v643_v59  ;;  %v305_v7 = vadd.f32 %v917_v4, %v237_v0  ;;  %v306_v8 = vadd.f32 %v918_v5, %v238_v3  ;;  %v933_v9 = vsel %vm325_vm6, 1.0, %v1195_v1  ;;  %v1102_v0 = vld [vmem:[#allocation7 + $0x8] sm:$0xff]  }
  0x63   :  { %v934_v11 = vsel %vm326_vm7, 1.0, %v1195_v1  ;;  %vm393_vm8 = vcmp.eq.s32.totalorder %v1276_v25, %v1266_v19  ;;  %vm394_vm9 = vcmp.eq.s32.totalorder %v1276_v25, %v101_v55  ;;  %vm461_vm10 = vcmp.eq.s32.totalorder %v1278_v26, %v1266_v19 }
  0x64   :  { %664 = vxpose.xlu0.c.b16.cont [4/8] (narrow) %v656_v6, 16  ;;  %v373_v15 = vadd.f32 %v933_v9, %v305_v7  ;;  %v374_v20 = vadd.f32 %v934_v11, %v306_v8  ;;  %v949_v14 = vsel %vm393_vm8, 1.0, %v1195_v1  ;;  %v950_v16 = vsel %vm394_vm9, 1.0, %v1195_v1 }
  0x65   :  { %vm462_vm11 = vcmp.eq.s32.totalorder %v1278_v26, %v101_v55  ;;  %v965_v29 = vsel %vm461_vm10, 1.0, %v1195_v1  ;;  %vm529_vm12 = vcmp.eq.s32.totalorder %v1280_v27, %v1266_v19  ;;  %vm530_vm13 = vcmp.eq.s32.totalorder %v1280_v27, %v101_v55 }
  0x66   :  { %v441_v30 = vadd.f32 %v949_v14, %v373_v15  ;;  %v442_v31 = vadd.f32 %v950_v16, %v374_v20  ;;  %v966_v32 = vsel %vm462_vm11, 1.0, %v1195_v1  ;;  %v981_v33 = vsel %vm529_vm12, 1.0, %v1195_v1 }
  0x67   :  { %v982_v35 = vsel %vm530_vm13, 1.0, %v1195_v1  ;;  %vm597_vm14 = vcmp.eq.s32.totalorder %v1282_v28, %v1266_v19  ;;  %vm598_vm15 = vcmp.eq.s32.totalorder %v1282_v28, %v101_v55  ;;  %v102_v36 = vadd.s32 80, %v1234_v2  ;;  %v1101_v55 = vld [vmem:[#allocation7 + $0x10] sm:$0xff]  }
  0x68   :  { %v509_v37 = vadd.f32 %v965_v29, %v441_v30  ;;  %v510_v38 = vadd.f32 %v966_v32, %v442_v31  ;;  %v997_v39 = vsel %vm597_vm14, 1.0, %v1195_v1  ;;  %v998_v40 = vsel %vm598_vm15, 1.0, %v1195_v1  ;;  %1071 = vmatpush3.bf16.msra.mxu1 %v1101_v55 }
  0x69   :  { %v103_v41 = vadd.s32 88, %v1234_v2  ;;  %vm123_vm0 = vcmp.eq.s32.totalorder %v1268_v21, %v102_v36  ;;  %vm191_vm1 = vcmp.eq.s32.totalorder %v1270_v22, %v102_v36  ;;  %vm259_vm2 = vcmp.eq.s32.totalorder %v1272_v23, %v102_v36  ;;  %1072 = vmatprep.subr.bf16.mxu1 %v1195_v1 }
  0x6a   :  { %v577_v19 = vadd.f32 %v981_v33, %v509_v37  ;;  %v578_v42 = vadd.f32 %v982_v35, %v510_v38  ;;  %v887_v43 = vsel %vm123_vm0, 1.0, %v1195_v1  ;;  %v903_v44 = vsel %vm191_vm1, 1.0, %v1195_v1 }
  0x6b   :  { %vm124_vm3 = vcmp.eq.s32.totalorder %v1268_v21, %v103_v41  ;;  %vm192_vm4 = vcmp.eq.s32.totalorder %v1270_v22, %v103_v41  ;;  %v239_v13 = vadd.f32 %v903_v44, %v887_v43  ;;  %vm260_vm5 = vcmp.eq.s32.totalorder %v1272_v23, %v103_v41 }
  0x6c   :  { %v645_v45 = vadd.f32 %v997_v39, %v577_v19  ;;  %v646_v46 = vadd.f32 %v998_v40, %v578_v42  ;;  %v888_v47 = vsel %vm124_vm3, 1.0, %v1195_v1  ;;  %v904_v48 = vsel %vm192_vm4, 1.0, %v1195_v1  ;;  %1073 = vmatpush3.bf16.msra.mxu1 %v1102_v0 }
  0x6d   :  { %v240_v49 = vadd.f32 %v904_v48, %v888_v47  ;;  %v919_v50 = vsel %vm259_vm2, 1.0, %v1195_v1  ;;  %v920_v51 = vsel %vm260_vm5, 1.0, %v1195_v1  ;;  %vm327_vm6 = vcmp.eq.s32.totalorder %v1274_v24, %v102_v36  ;;  %1074 = vmatprep.subr.bf16.mxu1 %v1195_v1 }
  0x6e   :  { %v657_v52 = vpack.c.bf16 %v646_v46, %v645_v45  ;;  %v307_v53 = vadd.f32 %v919_v50, %v239_v13  ;;  %vm328_vm7 = vcmp.eq.s32.totalorder %v1274_v24, %v103_v41  ;;  %v935_v54 = vsel %vm327_vm6, 1.0, %v1195_v1 }
  0x6f   :  { %v308_v56 = vadd.f32 %v920_v51, %v240_v49  ;;  %v936_v57 = vsel %vm328_vm7, 1.0, %v1195_v1  ;;  %vm395_vm8 = vcmp.eq.s32.totalorder %v1276_v25, %v102_v36  ;;  %vm396_vm9 = vcmp.eq.s32.totalorder %v1276_v25, %v103_v41 }
  0x70   :  { %665 = vxpose.xlu0.c.b16.cont [5/8] (narrow) %v657_v52, 16  ;;  %v375_v17 = vadd.f32 %v935_v54, %v307_v53  ;;  %v951_v18 = vsel %vm395_vm8, 1.0, %v1195_v1  ;;  %v952_v58 = vsel %vm396_vm9, 1.0, %v1195_v1  ;;  %vm463_vm10 = vcmp.eq.s32.totalorder %v1278_v26, %v102_v36 }
  0x71   :  { %v376_v59 = vadd.f32 %v936_v57, %v308_v56  ;;  %vm464_vm11 = vcmp.eq.s32.totalorder %v1278_v26, %v103_v41  ;;  %v967_v60 = vsel %vm463_vm10, 1.0, %v1195_v1  ;;  %vm531_vm12 = vcmp.eq.s32.totalorder %v1280_v27, %v102_v36 }
  0x72   :  { %v443_v61 = vadd.f32 %v951_v18, %v375_v17  ;;  %v968_v62 = vsel %vm464_vm11, 1.0, %v1195_v1  ;;  %vm532_vm13 = vcmp.eq.s32.totalorder %v1280_v27, %v103_v41  ;;  %v983_v63 = vsel %vm531_vm12, 1.0, %v1195_v1 }
  0x73   :  { %v444_v3 = vadd.f32 %v952_v58, %v376_v59  ;;  %v984_v4 = vsel %vm532_vm13, 1.0, %v1195_v1  ;;  %vm599_vm14 = vcmp.eq.s32.totalorder %v1282_v28, %v102_v36  ;;  %vm600_vm15 = vcmp.eq.s32.totalorder %v1282_v28, %v103_v41 }
  0x74   :  { %v511_v5 = vadd.f32 %v967_v60, %v443_v61  ;;  %v999_v6 = vsel %vm599_vm14, 1.0, %v1195_v1  ;;  %v1000_v7 = vsel %vm600_vm15, 1.0, %v1195_v1  ;;  %v104_v8 = vadd.s32 96, %v1234_v2 }
  0x75   :  { %v512_v9 = vadd.f32 %v968_v62, %v444_v3  ;;  %v105_v10 = vadd.s32 104, %v1234_v2  ;;  %v1572_v11 = vadd.s32 112, %v1234_v2  ;;  %v1575_v15 = vadd.s32 120, %v1234_v2 }
  0x76   :  { %v579_v20 = vadd.f32 %v983_v63, %v511_v5  ;;  %vm125_vm0 = vcmp.eq.s32.totalorder %v1268_v21, %v104_v8  ;;  %vm193_vm1 = vcmp.eq.s32.totalorder %v1270_v22, %v104_v8  ;;  %vm261_vm2 = vcmp.eq.s32.totalorder %v1272_v23, %v104_v8 }
  0x77   :  { %v580_v14 = vadd.f32 %v984_v4, %v512_v9  ;;  %vm126_vm3 = vcmp.eq.s32.totalorder %v1268_v21, %v105_v10  ;;  %v889_v16 = vsel %vm125_vm0, 1.0, %v1195_v1  ;;  %vm194_vm4 = vcmp.eq.s32.totalorder %v1270_v22, %v105_v10 }
  0x78   :  { %v647_v29 = vadd.f32 %v999_v6, %v579_v20  ;;  %v890_v2 = vsel %vm126_vm3, 1.0, %v1195_v1  ;;  %v905_v30 = vsel %vm193_vm1, 1.0, %v1195_v1  ;;  %v906_v31 = vsel %vm194_vm4, 1.0, %v1195_v1 }
  0x79   :  { %v648_v32 = vadd.f32 %v1000_v7, %v580_v14  ;;  %v241_v33 = vadd.f32 %v905_v30, %v889_v16  ;;  %v242_v34 = vadd.f32 %v906_v31, %v890_v2  ;;  %vm262_vm5 = vcmp.eq.s32.totalorder %v1272_v23, %v105_v10 }
  0x7a   :  { %v921_v35 = vsel %vm261_vm2, 1.0, %v1195_v1  ;;  %v922_v36 = vsel %vm262_vm5, 1.0, %v1195_v1  ;;  %vm329_vm6 = vcmp.eq.s32.totalorder %v1274_v24, %v104_v8  ;;  %vm330_vm7 = vcmp.eq.s32.totalorder %v1274_v24, %v105_v10 }
  0x7b   :  { %v658_v37 = vpack.c.bf16 %v648_v32, %v647_v29  ;;  %v309_v38 = vadd.f32 %v921_v35, %v241_v33  ;;  %v310_v39 = vadd.f32 %v922_v36, %v242_v34  ;;  %v937_v40 = vsel %vm329_vm6, 1.0, %v1195_v1  ;;  %v1103_v32 = vld [vmem:[#allocation7] sm:$0xff]   ;;  %v1013_v36 = vld [vmem:[%s1669_s3] ss:$0 sm:$0xff] }
  0x7c   :  { %v938_v41 = vsel %vm330_vm7, 1.0, %v1195_v1  ;;  %vm397_vm8 = vcmp.eq.s32.totalorder %v1276_v25, %v104_v8  ;;  %vm398_vm9 = vcmp.eq.s32.totalorder %v1276_v25, %v105_v10  ;;  %vm465_vm10 = vcmp.eq.s32.totalorder %v1278_v26, %v104_v8  ;;  %1075 = vmatpush3.bf16.msra.mxu1 %v1103_v32 }
  0x7d   :  { %666 = vxpose.xlu0.c.b16.cont [6/8] (narrow) %v658_v37, 16  ;;  %v377_v19 = vadd.f32 %v937_v40, %v309_v38  ;;  %v378_v42 = vadd.f32 %v938_v41, %v310_v39  ;;  %v953_v43 = vsel %vm397_vm8, 1.0, %v1195_v1  ;;  %v954_v44 = vsel %vm398_vm9, 1.0, %v1195_v1 }
  0x7e   :  { %vm466_vm11 = vcmp.eq.s32.totalorder %v1278_v26, %v105_v10  ;;  %v969_v12 = vsel %vm465_vm10, 1.0, %v1195_v1  ;;  %vm533_vm12 = vcmp.eq.s32.totalorder %v1280_v27, %v104_v8  ;;  %vm534_vm13 = vcmp.eq.s32.totalorder %v1280_v27, %v105_v10 }
  0x7f   :  { %v445_v13 = vadd.f32 %v953_v43, %v377_v19  ;;  %v446_v45 = vadd.f32 %v954_v44, %v378_v42  ;;  %v970_v46 = vsel %vm466_vm11, 1.0, %v1195_v1  ;;  %v985_v47 = vsel %vm533_vm12, 1.0, %v1195_v1 }
  0x80   :  { %v986_v48 = vsel %vm534_vm13, 1.0, %v1195_v1  ;;  %vm601_vm14 = vcmp.eq.s32.totalorder %v1282_v28, %v104_v8  ;;  %vm602_vm15 = vcmp.eq.s32.totalorder %v1282_v28, %v105_v10  ;;  %vm127_vm0 = vcmp.eq.s32.totalorder %v1268_v21, %v1572_v11 }
  0x81   :  { %v513_v49 = vadd.f32 %v969_v12, %v445_v13  ;;  %v514_v50 = vadd.f32 %v970_v46, %v446_v45  ;;  %v1001_v51 = vsel %vm601_vm14, 1.0, %v1195_v1  ;;  %v1002_v52 = vsel %vm602_vm15, 1.0, %v1195_v1 }
  0x82   :  { %vm128_vm1 = vcmp.eq.s32.totalorder %v1268_v21, %v1575_v15  ;;  %v891_v53 = vsel %vm127_vm0, 1.0, %v1195_v1  ;;  %vm195_vm2 = vcmp.eq.s32.totalorder %v1270_v22, %v1572_v11  ;;  %vm196_vm3 = vcmp.eq.s32.totalorder %v1270_v22, %v1575_v15 }
  0x83   :  { %v581_v54 = vadd.f32 %v985_v47, %v513_v49  ;;  %v582_v55 = vadd.f32 %v986_v48, %v514_v50  ;;  %v892_v56 = vsel %vm128_vm1, 1.0, %v1195_v1  ;;  %v907_v57 = vsel %vm195_vm2, 1.0, %v1195_v1 }
  0x84   :  { %v908_v17 = vsel %vm196_vm3, 1.0, %v1195_v1  ;;  %v243_v18 = vadd.f32 %v907_v57, %v891_v53  ;;  %vm263_vm4 = vcmp.eq.s32.totalorder %v1272_v23, %v1572_v11  ;;  %vm264_vm5 = vcmp.eq.s32.totalorder %v1272_v23, %v1575_v15 }
  0x85   :  { %v649_v21 = vadd.f32 %v1001_v51, %v581_v54  ;;  %v650_v58 = vadd.f32 %v1002_v52, %v582_v55  ;;  %v244_v59 = vadd.f32 %v908_v17, %v892_v56  ;;  %v923_v22 = vsel %vm263_vm4, 1.0, %v1195_v1 }
  0x86   :  { %v924_v60 = vsel %vm264_vm5, 1.0, %v1195_v1  ;;  %v311_v61 = vadd.f32 %v923_v22, %v243_v18  ;;  %vm331_vm6 = vcmp.eq.s32.totalorder %v1274_v24, %v1572_v11  ;;  %vm332_vm7 = vcmp.eq.s32.totalorder %v1274_v24, %v1575_v15 }
  0x87   :  { %v659_v62 = vpack.c.bf16 %v650_v58, %v649_v21  ;;  %v312_v63 = vadd.f32 %v924_v60, %v244_v59  ;;  %v939_v0 = vsel %vm331_vm6, 1.0, %v1195_v1  ;;  %v940_v23 = vsel %vm332_vm7, 1.0, %v1195_v1 }
  0x88   :  { %v379_v3 = vadd.f32 %v939_v0, %v311_v61  ;;  %vm399_vm8 = vcmp.eq.s32.totalorder %v1276_v25, %v1572_v11  ;;  %vm400_vm9 = vcmp.eq.s32.totalorder %v1276_v25, %v1575_v15  ;;  %vm467_vm10 = vcmp.eq.s32.totalorder %v1278_v26, %v1572_v11 }
  0x89   :  { %667 = vxpose.xlu0.c.b16.cont [7/8] (narrow) %v659_v62, 16  ;;  %v380_v4 = vadd.f32 %v940_v23, %v312_v63  ;;  %v955_v24 = vsel %vm399_vm8, 1.0, %v1195_v1  ;;  %v956_v5 = vsel %vm400_vm9, 1.0, %v1195_v1  ;;  %vm468_vm11 = vcmp.eq.s32.totalorder %v1278_v26, %v1575_v15 }
  0x8a   :  { %v447_v6 = vadd.f32 %v955_v24, %v379_v3  ;;  %v971_v7 = vsel %vm467_vm10, 1.0, %v1195_v1  ;;  %v972_v8 = vsel %vm468_vm11, 1.0, %v1195_v1  ;;  %vm535_vm12 = vcmp.eq.s32.totalorder %v1280_v27, %v1572_v11 }
  0x8b   :  { %v448_v25 = vadd.f32 %v956_v5, %v380_v4  ;;  %vm536_vm13 = vcmp.eq.s32.totalorder %v1280_v27, %v1575_v15  ;;  %v987_v9 = vsel %vm535_vm12, 1.0, %v1195_v1  ;;  %vm603_vm14 = vcmp.eq.s32.totalorder %v1282_v28, %v1572_v11 }
  0x8c   :  { %v515_v10 = vadd.f32 %v971_v7, %v447_v6  ;;  %v988_v26 = vsel %vm536_vm13, 1.0, %v1195_v1  ;;  %vm604_vm15 = vcmp.eq.s32.totalorder %v1282_v28, %v1575_v15  ;;  %v1003_v14 = vsel %vm603_vm14, 1.0, %v1195_v1 }
  0x8d   :  { %v516_v20 = vadd.f32 %v972_v8, %v448_v25  ;;  %v1004_v29 = vsel %vm604_vm15, 1.0, %v1195_v1  ;;  %vm1196_vm0 = vmmov 0  }
  0x8e   :  { %v583_v16 = vadd.f32 %v987_v9, %v515_v10  ;;  %1056 = vmatprep.mubr.msk.bf16.mxu0 %vm1196_vm0, %v1195_v1  ;;  %1076 = vmatprep.mubr.msk.bf16.mxu1 %vm1196_vm0, %v1195_v1 }
  0x8f   :  { %v584_v27 = vadd.f32 %v988_v26, %v516_v20 }
  0x90   :  { %v651_v2 = vadd.f32 %v1003_v14, %v583_v16 }
  0x91   :  { %v652_v11 = vadd.f32 %v1004_v29, %v584_v27 }
  0x93   :  { %v660_v30 = vpack.c.bf16 %v652_v11, %v651_v2 }
  0x95   :  { %668 = vxpose.xlu0.c.b16.end [8/8] (narrow) %v660_v30, 16 }
  0xdb   :  { %v669_v31 = vpop.trf.xlu0 }
  0xdc   :  { %1057 = vmatmul.mubr.bf16.vlgmr.msra.gmra.mxu0 %v669_v31 }
 0x19c   :  { %v759_v28 = vpop.f32.mrf.mxu0 }
 0x19d   :  { %v765_v15 = vpack.c.bf16 %v759_v28, %v759_v28 }
 0x19e   :  { %v1058_v33 = vpop.f32.mrf.mxu0 }
 0x19f   :  { %1077 = vmatmul.mubr.bf16.vlgmr.msra.gmra.mxu1 %v765_v15 }
 0x1a0   :  { %v762_v34 = vpop.f32.mrf.mxu0 }
 0x1a2   :  { %v1059_v35 = vpop.f32.mrf.mxu0 }
 0x25f   :  { %v854_v1 = vpop.f32.mrf.mxu1 }
 0x260   :  { %v855_v37 = vadd.f32 %v1013_v36, %v854_v1 }
 0x261   :  { %v1078_v38 = vpop.f32.mrf.mxu1 }
 0x262   :  { %860 = vst [vmem:[#allocation8] sm:$0xff] %v855_v37 }
 0x263   :  { %v857_v39 = vpop.f32.mrf.mxu1 }
 0x264   :  { %1175 = shalt.err (!%p1172_p5)
}
 0x265   :  { %870 = dma.vmem_to_hbm [thread:$0]  %s868_s6, 128, %s1670_s4, [#allocation4]   ;;  %v1079_v40 = vpop.f32.mrf.mxu1 }
 0x266   :  { %1188 = dma.done.wait [#allocation4], 128  }
 0x267   :  { %1189 = vsyncadd [#allocation4], 4294967168 }
 0x268   :  { %874 = vsyncpa [#allocation3], 1 }
 0x269   :  { %875 = vsyncpa [#allocation6], 1 }
 0x26a   :  { %876 = vsyncpa [#allocation4], 1 }

</bundles_post_ra>
